<compile_context>
chip_gen: v7x
topology: tpu7x:2x2x1
jax: 0.10.0
libtpu: 0.0.40
codegen_flags: <defaults>
</compile_context>

<pallas_src>
import jax
import jax.numpy as jnp
from jax.experimental import pallas as pl
from jax.experimental.pallas import tpu as pltpu


_VMEM_CAP_BYTES = 56 << 20          # stay under v7x's 64 MiB physical VMEM
_RESIDENT_WEIGHT_BUDGET = 40 << 20  # above this, use the K/N-tiled path


def _round_up(x, m):
    return (x + m - 1) // m * m


def _sublane_rows(dtype):
    # Rows per packed vreg sublane group: 8 (4-byte), 16 (2-byte), 32 (1-byte).
    return max(8, 32 // jnp.dtype(dtype).itemsize)


def _pick_tm(batch, row_bytes, g, block_rows, tile_bytes_target, ensure_multi_step):
    if block_rows is not None:
        tm = int(block_rows)
    else:
        tm = max(g, int(tile_bytes_target) // max(int(row_bytes), 1))
    tm = min(_round_up(tm, g), _round_up(batch, g))
    if ensure_multi_step and batch > g:
        # >= 2 grid steps so the "parallel" batch axis shards across v7x's 2 cores.
        tm = min(tm, _round_up(pl.cdiv(batch, 2), g))
    # Balance tiles: keep the tile count, minimize waste in the ragged last tile.
    n_tiles = pl.cdiv(batch, tm)
    tm = max(g, _round_up(pl.cdiv(batch, n_tiles), g))
    return tm


def _pick_block(dim, requested, candidates=(512, 256, 128)):
    if requested is not None:
        if dim % requested != 0:
            raise ValueError(f"block size {requested} must divide dimension {dim}")
        return int(requested)
    for c in candidates:
        if dim % c == 0:
            return c
    return dim  # full dimension is always a legal block


def _mlp_kernel_resident(x_ref, w_ref, b_ref, o_ref):
    # x: (TM, K), w: (K, N) resident, b: (1, N) resident -> o: (TM, N)
    y = jnp.dot(x_ref[...], w_ref[...], preferred_element_type=jnp.float32)
    y = y + b_ref[...]                       # f32 bias add (VPU)
    # TODO(synk): eval-mode dropout is identity; training mode would mask `y` here.
    o_ref[...] = jnp.tanh(y).astype(o_ref.dtype)   # tanh on EUP, cast to I/O dtype


def _mlp_kernel_tiled(x_ref, w_ref, b_ref, o_ref, acc_ref):
    # Grid: (B/TM, N/TN, K/TK), K last & "arbitrary"; acc_ref is f32 VMEM scratch.
    k = pl.program_id(2)

    @pl.when(k == 0)
    def _():
        acc_ref[...] = jnp.zeros_like(acc_ref)

    acc_ref[...] += jnp.dot(x_ref[...], w_ref[...],
                            preferred_element_type=jnp.float32)

    @pl.when(k == pl.num_programs(2) - 1)
    def _():
        o_ref[...] = jnp.tanh(acc_ref[...] + b_ref[...]).astype(o_ref.dtype)


def mlp_layer(features, weight, bias, *, block_rows=None, block_n=None,
              block_k=None, out_dtype=None, tile_bytes_target=4 << 20,
              ensure_multi_step=True, force_tiled=False, vmem_limit_bytes=None):
    """y = tanh(dropout(x @ W + b)) with eval-mode (identity) dropout.

    features: [B, H_in];  weight: [H_in, H_out] (i.e. torch Linear weight.T);
    bias: [H_out].  I/O dtypes follow the inputs (pass bf16 x/W for bf16 I/O);
    accumulation, bias-add and tanh are always float32.
    """
    B, H_in = features.shape
    h_in_w, H_out = weight.shape
    if h_in_w != H_in:
        raise ValueError("weight must be [H_in, H_out]")
    out_dtype = jnp.dtype(out_dtype if out_dtype is not None else features.dtype)

    xi = jnp.dtype(features.dtype).itemsize
    wi = jnp.dtype(weight.dtype).itemsize
    oi = out_dtype.itemsize
    g = _sublane_rows(features.dtype)

    bias2d = bias.reshape(1, H_out).astype(jnp.float32)
    weight_bytes = H_in * H_out * wi
    use_tiled = force_tiled or weight_bytes > _RESIDENT_WEIGHT_BUDGET

    cost = pl.CostEstimate(
        flops=2 * B * H_in * H_out,
        transcendentals=B * H_out,
        bytes_accessed=int(B * H_in * xi + weight_bytes + H_out * 4
                           + B * H_out * oi),
    )

    if not use_tiled:
        # ---- resident-weight path (weight/bias stay in VMEM, single-buffered) ----
        row_bytes = H_in * xi + H_out * oi
        tm = _pick_tm(B, row_bytes, g, block_rows, tile_bytes_target,
                      ensure_multi_step)

        def vmem_need(tm_):
            return (2 * tm_ * H_in * xi + 2 * tm_ * H_out * oi
                    + weight_bytes + 8 * _round_up(H_out, 128) * 4)

        while vmem_need(tm) > _VMEM_CAP_BYTES - (4 << 20) and tm > g:
            tm = max(g, _round_up(tm // 2, g))
        limit = vmem_limit_bytes or min(
            max(int(vmem_need(tm) * 1.25) + (2 << 20), 32 << 20), _VMEM_CAP_BYTES)

        grid = (pl.cdiv(B, tm),)
        return pl.pallas_call(
            _mlp_kernel_resident,
            out_shape=jax.ShapeDtypeStruct((B, H_out), out_dtype),
            grid_spec=pltpu.PrefetchScalarGridSpec(
                num_scalar_prefetch=0,
                grid=grid,
                in_specs=[
                    # x tile streams per grid step (ragged last block is masked).
                    pl.BlockSpec((tm, H_in), lambda i: (i, 0)),
                    # weight/bias: constant index_map -> VMEM-resident, 1 buffer.
                    pl.BlockSpec((H_in, H_out), lambda i: (0, 0),
                                 pipeline_mode=pl.Buffered(1)),
                    pl.BlockSpec((1, H_out), lambda i: (0, 0),
                                 pipeline_mode=pl.Buffered(1)),
                ],
                out_specs=pl.BlockSpec((tm, H_out), lambda i: (i, 0)),
            ),
            compiler_params=pltpu.CompilerParams(
                dimension_semantics=("parallel",),
                vmem_limit_bytes=limit),
            cost_estimate=cost,
        )(features, weight, bias2d)

    # ---- K/N-tiled accumulator path (large H: weight does not fit VMEM) ----
    tk = _pick_block(H_in, block_k)    # K must divide evenly (no garbage in acc)
    tn = _pick_block(H_out, block_n)
    row_bytes = tk * xi + tn * (oi + 4)
    tm = _pick_tm(B, row_bytes, g, block_rows, tile_bytes_target, ensure_multi_step)

    def vmem_need(tm_):
        return (2 * tm_ * tk * xi + 2 * tk * tn * wi + 2 * tm_ * tn * oi
                + tm_ * tn * 4 + 8 * _round_up(tn, 128) * 4)

    while vmem_need(tm) > _VMEM_CAP_BYTES - (4 << 20) and tm > g:
        tm = max(g, _round_up(tm // 2, g))
    limit = vmem_limit_bytes or min(
        max(int(vmem_need(tm) * 1.25) + (2 << 20), 32 << 20), _VMEM_CAP_BYTES)

    grid = (pl.cdiv(B, tm), H_out // tn, H_in // tk)
    return pl.pallas_call(
        _mlp_kernel_tiled,
        out_shape=jax.ShapeDtypeStruct((B, H_out), out_dtype),
        grid_spec=pltpu.PrefetchScalarGridSpec(
            num_scalar_prefetch=0,
            grid=grid,
            in_specs=[
                pl.BlockSpec((tm, tk), lambda i, j, k: (i, k)),
                pl.BlockSpec((tk, tn), lambda i, j, k: (k, j)),
                pl.BlockSpec((1, tn), lambda i, j, k: (0, j)),
            ],
            out_specs=pl.BlockSpec((tm, tn), lambda i, j, k: (i, j)),
            scratch_shapes=[pltpu.VMEM((tm, tn), jnp.float32)],
        ),
        compiler_params=pltpu.CompilerParams(
            dimension_semantics=("parallel", "parallel", "arbitrary"),
            vmem_limit_bytes=limit),
        cost_estimate=cost,
    )(features, weight, bias2d)


if __name__ == "__main__":
    hidden = 128          # config.hidden_size (lane-aligned)
    batch = 200           # not a tile multiple -> exercises ragged last block

    key = jax.random.PRNGKey(0)
    kx, kw, kb = jax.random.split(key, 3)

    features = jax.random.normal(kx, (batch, hidden), dtype=jnp.float32)
    # nn.Linear stores weight as [out, in]; transpose to [in, out] for x @ W.
    w_torch_layout = jax.random.normal(kw, (hidden, hidden), dtype=jnp.float32) * 0.02
    weight = w_torch_layout.T
    bias = jax.random.normal(kb, (hidden,), dtype=jnp.float32) * 0.02

    ref = jnp.tanh(features @ weight + bias)

    # f32 resident-weight path: no pad/slice, balanced 2-step grid (megacore-able).
    out_f32 = jax.block_until_ready(mlp_layer(features, weight, bias))
    assert out_f32.shape == (batch, hidden)
    assert jnp.allclose(out_f32, ref, atol=1e-5, rtol=1e-5)

    # bf16 end-to-end I/O path (caller supplies bf16 activations/weights; bf16 out).
    out_bf16 = jax.block_until_ready(
        mlp_layer(features.astype(jnp.bfloat16), weight.astype(jnp.bfloat16), bias))
    assert out_bf16.shape == (batch, hidden)
    assert out_bf16.dtype == jnp.bfloat16
    assert jnp.allclose(out_bf16.astype(jnp.float32), ref, atol=2e-2, rtol=2e-2)

    # K/N-tiled accumulator path (used automatically for large H; forced here with
    # 128-wide blocks on H=256 so the K axis really iterates).
    hidden2 = 256
    kx2, kw2, kb2 = jax.random.split(jax.random.PRNGKey(1), 3)
    f2 = jax.random.normal(kx2, (batch, hidden2), dtype=jnp.float32)
    w2 = (jax.random.normal(kw2, (hidden2, hidden2), dtype=jnp.float32) * 0.02).T
    b2 = jax.random.normal(kb2, (hidden2,), dtype=jnp.float32) * 0.02
    ref2 = jnp.tanh(f2 @ w2 + b2)
    out2 = jax.block_until_ready(
        mlp_layer(f2, w2, b2, force_tiled=True, block_n=128, block_k=128))
    assert out2.shape == (batch, hidden2)
    assert jnp.allclose(out2, ref2, atol=1e-4, rtol=1e-4)

    print("KERNEL_OK")
</pallas_src>

<mosaic_0001>
module attributes {stable_mosaic.version = 11 : i64} {
  func.func @_mlp_kernel_resident(%arg0: i32, %arg1: memref<104x128xf32, #tpu.memory_space<vmem>>, %arg2: memref<128x128xf32, #tpu.memory_space<vmem>>, %arg3: memref<1x128xf32, #tpu.memory_space<vmem>>, %arg4: memref<104x128xf32, #tpu.memory_space<vmem>>) attributes {dimension_semantics = [#tpu.dimension_semantics<parallel>], iteration_bounds = array<i64: 2>, scalar_prefetch = 0 : i64, scratch_operands = 0 : i64, tpu.core_type = #tpu.core_type<tc>, window_params = [{transform_indices = @transform_0, window_bounds = array<i64: 104, 128>}, {pipeline_mode = #tpu.pipeline_mode<synchronous>, transform_indices = @transform_1, window_bounds = array<i64: 128, 128>}, {pipeline_mode = #tpu.pipeline_mode<synchronous>, transform_indices = @transform_2, window_bounds = array<i64: 1, 128>}, {transform_indices = @transform_3, window_bounds = array<i64: 104, 128>}]} {
    %c0 = arith.constant 0 : index
    %c0_0 = arith.constant 0 : index
    %0 = vector.load %arg1[%c0, %c0_0] : memref<104x128xf32, #tpu.memory_space<vmem>>, vector<104x128xf32>
    %c0_1 = arith.constant 0 : index
    %c0_2 = arith.constant 0 : index
    %1 = vector.load %arg2[%c0_1, %c0_2] : memref<128x128xf32, #tpu.memory_space<vmem>>, vector<128x128xf32>
    %cst = arith.constant dense<0.000000e+00> : vector<104x128xf32>
    %2 = tpu.matmul %0, %1, %cst {dimension_numbers = #tpu.dot_dimension_numbers<[1], [0], [0], [1], [0, 0, 1, 1], [], []>} : vector<104x128xf32>, vector<128x128xf32>, vector<104x128xf32> -> vector<104x128xf32>
    %c0_3 = arith.constant 0 : index
    %c0_4 = arith.constant 0 : index
    %3 = vector.load %arg3[%c0_3, %c0_4] : memref<1x128xf32, #tpu.memory_space<vmem>>, vector<1x128xf32>
    %4 = vector.broadcast %3 : vector<1x128xf32> to vector<104x128xf32>
    %5 = arith.addf %2, %4 : vector<104x128xf32>
    %6 = math.tanh %5 : vector<104x128xf32>
    %c0_5 = arith.constant 0 : index
    %c0_6 = arith.constant 0 : index
    %7 = vector.load %arg4[%c0_5, %c0_6] : memref<104x128xf32, #tpu.memory_space<vmem>>, vector<104x128xf32>
    tpu.vector_store %arg4[%c0_5, %c0_6], %6 {strides = array<i32>} : memref<104x128xf32, #tpu.memory_space<vmem>>, vector<104x128xf32>,
    return
  }
  func.func @transform_0(%arg0: i32) -> (i32, i32) {
    %c0_i32 = arith.constant 0 : i32
    %c0_i32_0 = arith.constant 0 : i32
    return %arg0, %c0_i32 : i32, i32
  }
  func.func @transform_1(%arg0: i32) -> (i32, i32) {
    %c0_i32 = arith.constant 0 : i32
    %c0_i32_0 = arith.constant 0 : i32
    %c0_i32_1 = arith.constant 0 : i32
    return %c0_i32, %c0_i32_0 : i32, i32
  }
  func.func @transform_2(%arg0: i32) -> (i32, i32) {
    %c0_i32 = arith.constant 0 : i32
    %c0_i32_0 = arith.constant 0 : i32
    %c0_i32_1 = arith.constant 0 : i32
    return %c0_i32, %c0_i32_0 : i32, i32
  }
  func.func @transform_3(%arg0: i32) -> (i32, i32) {
    %c0_i32 = arith.constant 0 : i32
    %c0_i32_0 = arith.constant 0 : i32
    return %arg0, %c0_i32 : i32, i32
  }
}

</mosaic_0001>

<bundles_post_ra>
// kernel: tpu_custom_call.1
= control target key start
LH: loop header
LB: loop body
LE: loop exit
PB: predicated region body
PF: predicated region fallthrough
CT: control target
= control target key end

     0   :  { %8 = vsyncpa [#allocation3], 0  ;;  %s1214_s0 = inlined_call_operand.hbm [shape: f32[200,128], index: 0, kind: input, shape index: {}]   ;;  %s1215_s1 = inlined_call_operand.hbm [shape: f32[128,128], index: 1, kind: input, shape index: {}]   ;;  %s1216_s2 = inlined_call_operand.vmem [shape: f32[1,128], index: 2, kind: input, shape index: {}]   ;;  %s1217_s3 = inlined_call_operand.hbm [shape: f32[200,128], index: 3, kind: output, shape index: {}]  }
   0x1   :  { %10 = vsyncpa [#allocation3 + $0x1], 0 }
   0x2   :  { %11 = vsyncpa [#allocation6], 0 }
   0x3   :  { %12 = vsyncpa [#allocation4], 0 }
   0x4   :  { %14 = vsyncpa [#allocation4 + $0x1], 0  ;;  %s923_s12 = smov 0   ;;  %s925_s13 = smov 0  }
   0x5   :  { %s927_s14 = smov 0   ;;  %s929_s15 = smov 0  }
   0x6 LB: > { %s944_s16 = sadd.s32 4294967295, %s889_s15   ;;  %s515_s17 = sadd.s32 4294967294, %s889_s15   ;;  %s889_s15 = sphi %s929_s15, %s1237_s15   ;;  %s885_s14 = sphi %s927_s14, %s1236_s14   ;;  %s881_s13 = sphi %s925_s13, %s1235_s13   ;;  %s877_s12 = sphi %s923_s12, %s1234_s12  }
   0x7   : > { %s948_s18 = sadd.s32 1, %s889_s15   ;;  %s27_s19 = sadd.s32 1, %s885_s14 }
   0x8   : > { %s24_s20 = ssub.s32 %s889_s15, %s948_s18  ;;  %p34_p0 = scmp.ne.s32.totalorder %s885_s14, %s881_s13 }
   0x9   : > { %p25_p1 = scmp.eq.s32.totalorder %s24_s20, 0  ;;  %p35_p2 = scmp.eq.s32.totalorder %s889_s15, 0 }
   0xa   : > { %p40_p3 = scmp.ne.s32.totalorder %s881_s13, %s877_s12  ;;  %p1218_p4 = scmp.eq.s32.totalorder %s944_s16, 0 }
   0xb   : > { %s960_s21 = scalar_select %p25_p1, %s885_s14, %s27_s19  }
   0xc   : > { %p962_p5 = por %p35_p2, %p34_p0  ;;  %p968_p6 = por %p1218_p4, %p40_p3 }
   0xd   : > { %p106_p7 = scmp.eq.s32.totalorder %s944_s16, 1  ;;  %p112_p8 = scmp.eq.s32.totalorder %s515_s17, 1 }
   0xe   : > { %s1221_s22 = scalar_select %p962_p5, 1, 0 }
   0xf   : > { %s1222_s23 = scalar_select %p968_p6, 1, 0 }
  0x10   : > { %p516_p9 = scmp.ge.s32.totalorder %s889_s15, 1  ;;  %p119_p10 = scmp.lt.s32.totalorder %s889_s15, 3 }
  0x11   : > { %p975_p11 = por %p106_p7, %p34_p0  ;;  %p979_p12 = por %p112_p8, %p40_p3 }
  0x12   : > { %p983_p13 = pnand %p516_p9, %p119_p10  ;;  %s891_s27 = smov [#allocation5]  }
  0x13   : > { %s1223_s24 = scalar_select %p975_p11, 1, 0 }
  0x14   : > { %s1224_s25 = scalar_select %p979_p12, 1, 0 }
  0x15   : > { %s1225_s26 = scalar_select %p983_p13, 1, 0 }
  0x16   : > { %p684_p1 = pneg %p983_p13  ;;  %s131_s28 = sshll.u32 %s891_s27, 4  ;;  %s132_s28 = int_to_ptr.vmem [resolvable:$true] %s131_s28 }
  0x17   : > { %s763_s5 = scalar_lea.hbm %s1215_s1, 2048 }
  0x18   : > { %p991_p2 = pnand %p684_p1, %p1218_p4  ;;  %p764_p0 = scmp.ne.s32.totalorder %s1215_s1, %s763_s5 }
  0x19   : > { %p770_p9 = scmp.lt.u32.totalorder %s763_s5, %s1215_s1 }
  0x1a   : > { %p765_p3 = pneg %p991_p2 }
  0x1c   : > { %p766_p7 = pnand %p765_p3, %p764_p0 }
  0x1e   : > { %p767_p8 = pneg %p766_p7 }
  0x20   : > { %p772_p10 = pnand %p770_p9, %p767_p8 }
  0x22   : > { %775 = shalt.err (!%p772_p10)
}
  0x23   : > { %s776_s10 = scalar_lea.vmem %s132_s28, 2048  ;;  %p784_p11 = scmp.lt.s32.totalorder %s132_s28, %s132_s28 }
  0x24   : > { %p777_p1 = scmp.ne.s32.totalorder %s132_s28, %s776_s10  ;;  %p785_p6 = scmp.lt.s32.totalorder %s776_s10, %s776_s10 }
  0x26   : > { %p779_p4 = pnand %p777_p1, %p765_p3  ;;  %p786_p13 = por %p785_p6, %p784_p11 }
  0x28   : > { %p780_p12 = pneg %p779_p4 }
  0x2a   : > { %p787_p5 = pnand %p786_p13, %p780_p12 }
  0x2c   : > { %790 = shalt.err (!%p787_p5)
}
  0x2d   : > { %s892_s11 = smov 128   ;;  %s893_s17 = smov 8  }
  0x2e   : > { %687 = dma.hbm_to_vmem [thread:$0]  (!%p991_p2), %s1215_s1, 2048, %s132_s28, [#allocation6], %s892_s11, %s892_s11, %s893_s17  }
  0x2f   : > { %p518_p0 = scmp.ge.s32.totalorder %s889_s15, 2 }
  0x30   : > { %p1227_p4 = scmp.ne.s32.totalorder (!%p518_p0), %s1221_s22, 0 }
  0x31   : > { %144 = sbr.rel (%p518_p0) target bundleno = 91 (0x5b), region = 24 }
  0x38   : > { %147 = sbr.rel (!%p1227_p4) target bundleno = 91 (0x5b), region = 28  ;;  %s148_s27 = sand.u32 (%p1227_p4), 1, %s885_s14  }
  0x39   : > { %s153_s30 = smul.u32 (%p1227_p4), 13, %s889_s15  ;;  %s1021_s6 = scalar_lea.sflag (%p1227_p4), [#allocation3], %s148_s27 }
  0x3a   : > { %s676_s4 = smul.u32 (%p1227_p4), 104, %s148_s27 }
  0x3b   : > { %s154_s5 = ssub.s32 (%p1227_p4), 25, %s153_s30 }
  0x3c   : > { %p155_p5 = scmp.lt.s32.totalorder (%p1227_p4), %s154_s5, 13  ;;  %s152_s7 = scalar_lea.vmem (%p1227_p4), [#allocation2], %s676_s4 }
  0x3f   : > { %s1239_s5 = smov (!%p155_p5, %s154_s5), 13 }
  0x40   : > { %s1018_s29 = sshll.u32 %s1239_s5, 7 }
  0x41   : > { %s159_s28 = ssub.s32 1664, %s1018_s29 }
  0x42   : > { %160 = vsyncadd %s1021_s6, %s159_s28  ;;  %p520_p6 = scmp.ne.s32.totalorder %s1018_s29, 0  ;;  %s534_s22 = smul.u32 1664, %s889_s15 }
  0x43   : > { %s165_s8 = sshll.u32 %s152_s7, 4  ;;  %s795_s27 = scalar_lea.hbm %s1214_s0, 3200  ;;  %s1031_s8 = int_to_ptr.vmem [resolvable:$true] %s165_s8 }
  0x44   : > { %s1029_s11 = scalar_lea.hbm %s1214_s0, %s534_s22 }
  0x45   : > { %s791_s17 = scalar_lea.hbm %s1029_s11, %s1018_s29  ;;  %p796_p2 = scmp.lt.u32.totalorder %s1029_s11, %s1214_s0 }
  0x46   : > { %p792_p11 = scmp.ne.s32.totalorder %s1029_s11, %s791_s17  ;;  %p797_p3 = scmp.lt.u32.totalorder %s795_s27, %s791_s17 }
  0x47   : > { %p799_p8 = scmp.lt.u32.totalorder %s791_s17, %s1029_s11 }
  0x48   : > { %p793_p12 = pnand %p792_p11, %p520_p6  ;;  %p798_p7 = por %p797_p3, %p796_p2 }
  0x4a   : > { %p794_p13 = pneg %p793_p12  ;;  %p800_p9 = por %p799_p8, %p798_p7 }
  0x4c   : > { %p801_p10 = pnand %p800_p9, %p794_p13 }
  0x4e   : > { %804 = shalt.err (!%p801_p10)
}
  0x4f   : > { %s805_s5 = scalar_lea.vmem %s1031_s8, %s1018_s29  ;;  %s894_s28 = smov [#allocation2]  }
  0x50   : > { %p806_p1 = scmp.ne.s32.totalorder %s1031_s8, %s805_s5  ;;  %s809_s7 = sshll.u32 %s894_s28, 4  ;;  %s810_s7 = int_to_ptr.vmem [resolvable:$false] %s809_s7 }
  0x51   : > { %s811_s22 = scalar_lea.vmem %s810_s7, 3328  ;;  %p812_p11 = scmp.lt.s32.totalorder %s1031_s8, %s810_s7 }
  0x52   : > { %p807_p4 = pnand %p806_p1, %p520_p6  ;;  %p813_p12 = scmp.lt.s32.totalorder %s811_s22, %s805_s5 }
  0x54   : > { %p808_p5 = pneg %p807_p4  ;;  %p814_p2 = por %p813_p12, %p812_p11 }
  0x56   : > { %p815_p3 = pnand %p814_p2, %p808_p5 }
  0x58   : > { %818 = shalt.err (!%p815_p3)
}
  0x59   : > { %s895_s9 = smov 128   ;;  %s896_s10 = smov 8  }
  0x5a   : > { %171 = dma.hbm_to_vmem [thread:$0]  (%p520_p6), %s1029_s11, %s1018_s29, %s1031_s8, %s1021_s6, %s895_s9, %s895_s9, %s896_s10  }
  0x5b PF: > { %p1228_p13 = scmp.ne.s32.totalorder %s1225_s26, 0 }
  0x5c   : > { %s1061_s17 = sand.u32 (!%p1228_p13), 1, %s881_s13   ;;  %p1229_p7 = scmp.ne.s32.totalorder (!%p1228_p13), %s1222_s23, 0 }
  0x5d   : > { %177 = sbr.rel (%p1228_p13) target bundleno = 416 (0x1a0), region = 32  ;;  %s180_s20 = scalar_lea.sflag (!%p1228_p13), [#allocation3], %s1061_s17 }
  0x5e   : > { %s677_s19 = smul.u32 (!%p1228_p13), 104, %s1061_s17 }
  0x60   : > { %s1067_s27 = scalar_lea.vmem (!%p1228_p13), [#allocation2], %s677_s19 }
  0x64   : > { %864 = dma.done.wait (%p1229_p7), %s180_s20, 1664  }
  0x65   : > { %866 = vsyncadd (%p1229_p7), %s180_s20, 4294965632  ;;  %p1230_p6 = scmp.eq.s32.totalorder %s944_s16, 0 }
  0x67   : > { %868 = dma.done.wait (%p1230_p6), [#allocation6], 2048   ;;  %p1231_p8 = pmov %p1230_p6 }
  0x68   : > { %v897_v0 = vmov 0.0|0.0   ;;  %vm898_vm0 = vmmov 0   ;;  %v899_v1 = vmov 0.0   ;;  %v233_v2 = vld [vmem:[#allocation5] sm:$0xff]  ;;  %v234_v3 = vld [vmem:[#allocation5 + $0x8] sm:$0xff]  ;;  %v235_v4 = vld [vmem:[#allocation5 + $0x10] sm:$0xff] }
  0x69   : > { %870 = vsyncadd (%p1231_p8), [#allocation6], 4294965248  ;;  %636 = vmatprep.subr.bf16.mxu0 %v897_v0  ;;  %660 = vmatprep.subr.bf16.mxu1 %v897_v0  ;;  %v637_v5 = vpack.c.bf16 %v234_v3, %v233_v2  ;;  %v236_v6 = vld [vmem:[#allocation5 + $0x18] sm:$0xff]  ;;  %v237_v8 = vld [vmem:[#allocation5 + $0x20] sm:$0xff]  ;;  %s1131_s29 = scalar_lea.vmem [#allocation7], %s677_s19  ;;  %s413_s6 = scalar_lea.sflag [#allocation4], %s1061_s17 }
  0x6a   : > { %597 = vmatprep.mubr.msk.f32.mxu0 %vm898_vm0, %v899_v1  ;;  %618 = vmatprep.mubr.msk.f32.mxu1 %vm898_vm0, %v899_v1  ;;  %v640_v7 = vpack.c.bf16 %v236_v6, %v235_v4  ;;  %v238_v9 = vld [vmem:[#allocation5 + $0x28] sm:$0xff]  ;;  %v239_v11 = vld [vmem:[#allocation5 + $0x30] sm:$0xff]  ;;  %v240_v12 = vld [vmem:[#allocation5 + $0x38] sm:$0xff]  ;;  %p1232_p9 = scmp.ne.s32.totalorder %s1223_s24, 0 }
  0x6b   : > { %638 = vmatpush3.bf16.msra.mxu0 %v637_v5  ;;  %668 = vmatpush3.bf16.msra.mxu1 %v637_v5  ;;  %v643_v10 = vpack.c.bf16 %v238_v9, %v237_v8  ;;  %v646_v13 = vpack.c.bf16 %v240_v12, %v239_v11  ;;  %v241_v14 = vld [vmem:[#allocation5 + $0x40] sm:$0xff]  ;;  %v242_v15 = vld [vmem:[#allocation5 + $0x48] sm:$0xff]  ;;  %v243_v17 = vld [vmem:[#allocation5 + $0x50] sm:$0xff]  ;;  %s420_s8 = smul.u32 (%p1232_p9), 13, %s944_s16 }
  0x6c   : > { %639 = vmatprep.subr.bf16.mxu0 %v897_v0  ;;  %661 = vmatprep.subr.bf16.mxu1 %v897_v0  ;;  %v649_v16 = vpack.c.bf16 %v242_v15, %v241_v14  ;;  %v244_v18 = vld [vmem:[#allocation5 + $0x58] sm:$0xff]  ;;  %v245_v20 = vld [vmem:[#allocation5 + $0x60] sm:$0xff]  ;;  %v246_v21 = vld [vmem:[#allocation5 + $0x68] sm:$0xff] }
  0x6d   : > { %v652_v19 = vpack.c.bf16 %v244_v18, %v243_v17  ;;  %v655_v22 = vpack.c.bf16 %v246_v21, %v245_v20  ;;  %v247_v23 = vld [vmem:[#allocation5 + $0x70] sm:$0xff]  ;;  %v248_v24 = vld [vmem:[#allocation5 + $0x78] sm:$0xff]  ;;  %v222_v30 = vld [vmem:[%s1067_s27 + $0x10] sm:$0xff]  ;;  %s421_s11 = ssub.s32 (%p1232_p9), 25, %s420_s8 }
  0x6e   : > { %v658_v25 = vpack.c.bf16 %v248_v24, %v247_v23  ;;  %v220_v26 = vld [vmem:[%s1067_s27] sm:$0xff]  ;;  %v227_v27 = vld [vmem:[%s1067_s27 + $0x38] sm:$0xff]  ;;  %v221_v28 = vld [vmem:[%s1067_s27 + $0x8] sm:$0xff]  ;;  %p422_p10 = scmp.lt.s32.totalorder (%p1232_p9), %s421_s11, 13 }
  0x6f   : > { %641 = vmatpush3.bf16.msra.mxu0 %v640_v7  ;;  %669 = vmatpush3.bf16.msra.mxu1 %v640_v7  ;;  %v228_v29 = vld [vmem:[%s1067_s27 + $0x40] sm:$0xff]  ;;  %v229_v31 = vld [vmem:[%s1067_s27 + $0x48] sm:$0xff]  ;;  %v223_v32 = vld [vmem:[%s1067_s27 + $0x18] sm:$0xff] }
  0x70   : > { %642 = vmatprep.subr.bf16.mxu0 %v897_v0  ;;  %662 = vmatprep.subr.bf16.mxu1 %v897_v0  ;;  %v230_v33 = vld [vmem:[%s1067_s27 + $0x50] sm:$0xff]  ;;  %v224_v34 = vld [vmem:[%s1067_s27 + $0x20] sm:$0xff]  ;;  %v231_v35 = vld [vmem:[%s1067_s27 + $0x58] sm:$0xff] }
  0x71   : > { %v225_v36 = vld [vmem:[%s1067_s27 + $0x28] sm:$0xff]  ;;  %v232_v37 = vld [vmem:[%s1067_s27 + $0x60] sm:$0xff]  ;;  %v226_v38 = vld [vmem:[%s1067_s27 + $0x30] sm:$0xff] }
  0x72   : > { %v1119_v39 = vld [vmem:[%s1216_s2] ss:$0 sm:$0xff] }
  0x73   : > { %644 = vmatpush3.bf16.msra.mxu0 %v643_v10  ;;  %670 = vmatpush3.bf16.msra.mxu1 %v643_v10 }
  0x74   : > { %645 = vmatprep.subr.bf16.mxu0 %v897_v0  ;;  %663 = vmatprep.subr.bf16.mxu1 %v897_v0 }
  0x77   : > { %647 = vmatpush3.bf16.msra.mxu0 %v646_v13  ;;  %671 = vmatpush3.bf16.msra.mxu1 %v646_v13 }
  0x78   : > { %648 = vmatprep.subr.bf16.mxu0 %v897_v0  ;;  %664 = vmatprep.subr.bf16.mxu1 %v897_v0 }
  0x7b   : > { %650 = vmatpush3.bf16.msra.mxu0 %v649_v16  ;;  %672 = vmatpush3.bf16.msra.mxu1 %v649_v16 }
  0x7c   : > { %651 = vmatprep.subr.bf16.mxu0 %v897_v0  ;;  %665 = vmatprep.subr.bf16.mxu1 %v897_v0 }
  0x7f   : > { %653 = vmatpush3.bf16.msra.mxu0 %v652_v19  ;;  %673 = vmatpush3.bf16.msra.mxu1 %v652_v19 }
  0x80   : > { %654 = vmatprep.subr.bf16.mxu0 %v897_v0  ;;  %666 = vmatprep.subr.bf16.mxu1 %v897_v0 }
  0x83   : > { %656 = vmatpush3.bf16.msra.mxu0 %v655_v22  ;;  %674 = vmatpush3.bf16.msra.mxu1 %v655_v22 }
  0x84   : > { %657 = vmatprep.subr.bf16.mxu0 %v897_v0  ;;  %667 = vmatprep.subr.bf16.mxu1 %v897_v0 }
  0x87   : > { %659 = vmatpush3.bf16.msra.mxu0 %v658_v25  ;;  %675 = vmatpush3.bf16.msra.mxu1 %v658_v25 }
  0x8a   : > { %598 = vmatmul.mubr.f32.vlgmr.msra.gmra.mrb[0].mxu0 %v220_v26  ;;  %619 = vmatmul.mubr.f32.vlgmr.msra.gmra.mrb[0].mxu1 %v227_v27 }
  0x8b   : > { %600 = vmatprep.mubr.msk.f32.mxu0 %vm898_vm0, %v899_v1  ;;  %621 = vmatprep.mubr.msk.f32.mxu1 %vm898_vm0, %v899_v1 }
  0x8e   : > { %601 = vmatmul.mubr.f32.gmra.mrb[2].mxu0 %v221_v28  ;;  %622 = vmatmul.mubr.f32.gmra.mrb[2].mxu1 %v228_v29 }
  0x8f   : > { %603 = vmatprep.mubr.msk.f32.mxu0 %vm898_vm0, %v899_v1  ;;  %624 = vmatprep.mubr.msk.f32.mxu1 %vm898_vm0, %v899_v1 }
  0x92   : > { %604 = vmatmul.mubr.f32.gmra.mrb[4].mxu0 %v222_v30  ;;  %625 = vmatmul.mubr.f32.gmra.mrb[4].mxu1 %v229_v31 }
  0x93   : > { %606 = vmatprep.mubr.msk.f32.mxu0 %vm898_vm0, %v899_v1  ;;  %627 = vmatprep.mubr.msk.f32.mxu1 %vm898_vm0, %v899_v1 }
  0x96   : > { %607 = vmatmul.mubr.f32.gmra.mrb[6].mxu0 %v223_v32  ;;  %628 = vmatmul.mubr.f32.gmra.mrb[6].mxu1 %v230_v33 }
  0x97   : > { %609 = vmatprep.mubr.msk.f32.mxu0 %vm898_vm0, %v899_v1  ;;  %630 = vmatprep.mubr.msk.f32.mxu1 %vm898_vm0, %v899_v1 }
  0x9a   : > { %610 = vmatmul.mubr.f32.gmra.mrb[8].mxu0 %v224_v34  ;;  %631 = vmatmul.mubr.f32.gmra.mrb[8].mxu1 %v231_v35 }
  0x9b   : > { %612 = vmatprep.mubr.msk.f32.mxu0 %vm898_vm0, %v899_v1  ;;  %633 = vmatprep.mubr.msk.f32.mxu1 %vm898_vm0, %v899_v1 }
  0x9e   : > { %613 = vmatmul.mubr.f32.gmra.mrb[10].mxu0 %v225_v36  ;;  %634 = vmatmul.mubr.f32.gmra.mrb[10].mxu1 %v232_v37 }
  0x9f   : > { %615 = vmatprep.mubr.msk.f32.mxu0 %vm898_vm0, %v899_v1 }
  0xa2   : > { %616 = vmatmul.mubr.f32.gmra.mrb[12].mxu0 %v226_v38 }
 0x15d   : > { %v322_v40 = vpop.f32.mrb[0].mxu0  ;;  %v357_v41 = vpop.f32.mrb[0].mxu1 }
 0x15e   : > { %v323_v42 = vadd.f32 %v1119_v39, %v322_v40  ;;  %v599_v43 = vpop.f32.mrb[1].mxu0  ;;  %v358_v44 = vadd.f32 %v1119_v39, %v357_v41  ;;  %v620_v45 = vpop.f32.mrb[1].mxu1 }
 0x160   : > { %737 = vtanh.f32 %v323_v42 }
 0x161   : > { %739 = vtanh.f32 %v358_v44  ;;  %v327_v46 = vpop.f32.mrb[2].mxu0  ;;  %v362_v47 = vpop.f32.mrb[2].mxu1 }
 0x162   : > { %v328_v48 = vadd.f32 %v1119_v39, %v327_v46  ;;  %v602_v49 = vpop.f32.mrb[3].mxu0  ;;  %v363_v50 = vadd.f32 %v1119_v39, %v362_v47  ;;  %v623_v51 = vpop.f32.mrb[3].mxu1 }
 0x164   : > { %741 = vtanh.f32 %v328_v48 }
 0x165   : > { %743 = vtanh.f32 %v363_v50  ;;  %v332_v52 = vpop.f32.mrb[4].mxu0  ;;  %v367_v53 = vpop.f32.mrb[4].mxu1 }
 0x166   : > { %v333_v54 = vadd.f32 %v1119_v39, %v332_v52  ;;  %v605_v55 = vpop.f32.mrb[5].mxu0  ;;  %v368_v56 = vadd.f32 %v1119_v39, %v367_v53  ;;  %v626_v57 = vpop.f32.mrb[5].mxu1 }
 0x168   : > { %745 = vtanh.f32 %v333_v54 }
 0x169   : > { %747 = vtanh.f32 %v368_v56  ;;  %v337_v58 = vpop.f32.mrb[6].mxu0  ;;  %v372_v59 = vpop.f32.mrb[6].mxu1 }
 0x16a   : > { %v738_v60 = vpop.eup %737  ;;  %v338_v61 = vadd.f32 %v1119_v39, %v337_v58  ;;  %v608_v62 = vpop.f32.mrb[7].mxu0  ;;  %v373_v63 = vadd.f32 %v1119_v39, %v372_v59 }
 0x16b   : > { %v629_v0 = vpop.f32.mrb[7].mxu1  ;;  %v740_v1 = vpop.eup %739  ;;  %399 = vst [vmem:[%s1131_s29] sm:$0xff] %v738_v60 }
 0x16c   : > { %406 = vst [vmem:[%s1131_s29 + $0x38] sm:$0xff] %v740_v1  ;;  %749 = vtanh.f32 %v338_v61 }
 0x16d   : > { %751 = vtanh.f32 %v373_v63  ;;  %v342_v2 = vpop.f32.mrb[8].mxu0  ;;  %v377_v3 = vpop.f32.mrb[8].mxu1 }
 0x16e   : > { %v742_v4 = vpop.eup %741  ;;  %v343_v5 = vadd.f32 %v1119_v39, %v342_v2  ;;  %v611_v6 = vpop.f32.mrb[9].mxu0  ;;  %v378_v7 = vadd.f32 %v1119_v39, %v377_v3 }
 0x16f   : > { %v632_v8 = vpop.f32.mrb[9].mxu1  ;;  %v744_v9 = vpop.eup %743  ;;  %400 = vst [vmem:[%s1131_s29 + $0x8] sm:$0xff] %v742_v4 }
 0x170   : > { %407 = vst [vmem:[%s1131_s29 + $0x40] sm:$0xff] %v744_v9  ;;  %753 = vtanh.f32 %v343_v5 }
 0x171   : > { %755 = vtanh.f32 %v378_v7  ;;  %v347_v10 = vpop.f32.mrb[10].mxu0  ;;  %v382_v11 = vpop.f32.mrb[10].mxu1 }
 0x172   : > { %v746_v12 = vpop.eup %745  ;;  %v348_v13 = vadd.f32 %v1119_v39, %v347_v10  ;;  %v614_v14 = vpop.f32.mrb[11].mxu0  ;;  %v383_v15 = vadd.f32 %v1119_v39, %v382_v11 }
 0x173   : > { %v635_v16 = vpop.f32.mrb[11].mxu1  ;;  %v748_v17 = vpop.eup %747  ;;  %401 = vst [vmem:[%s1131_s29 + $0x10] sm:$0xff] %v746_v12 }
 0x174   : > { %408 = vst [vmem:[%s1131_s29 + $0x48] sm:$0xff] %v748_v17  ;;  %757 = vtanh.f32 %v348_v13 }
 0x175   : > { %759 = vtanh.f32 %v383_v15  ;;  %v352_v18 = vpop.f32.mrb[12].mxu0 }
 0x176   : > { %v750_v19 = vpop.eup %749  ;;  %v353_v20 = vadd.f32 %v1119_v39, %v352_v18  ;;  %v617_v21 = vpop.f32.mrb[13].mxu0 }
 0x177   : > { %v752_v22 = vpop.eup %751  ;;  %402 = vst [vmem:[%s1131_s29 + $0x18] sm:$0xff] %v750_v19 }
 0x178   : > { %409 = vst [vmem:[%s1131_s29 + $0x50] sm:$0xff] %v752_v22  ;;  %761 = vtanh.f32 %v353_v20 }
 0x17a   : > { %v754_v23 = vpop.eup %753 }
 0x17b   : > { %v756_v24 = vpop.eup %755  ;;  %403 = vst [vmem:[%s1131_s29 + $0x20] sm:$0xff] %v754_v23 }
 0x17c   : > { %410 = vst [vmem:[%s1131_s29 + $0x58] sm:$0xff] %v756_v24 }
 0x17d   : > { %419 = sbr.rel (!%p1232_p9) target bundleno = 416 (0x1a0), region = 44 }
 0x17e   : > { %v758_v25 = vpop.eup %757 }
 0x17f   : > { %v760_v26 = vpop.eup %759  ;;  %404 = vst [vmem:[%s1131_s29 + $0x28] sm:$0xff] %v758_v25 }
 0x180   : > { %411 = vst [vmem:[%s1131_s29 + $0x60] sm:$0xff] %v760_v26 }
 0x182   : > { %v762_v27 = vpop.eup %761 }
 0x183   : > { %405 = vst [vmem:[%s1131_s29 + $0x30] sm:$0xff] %v762_v27 }
 0x184   : > { %s1241_s11 = smov (!%p422_p10, %s421_s11), 13 }
 0x185   : > { %s1155_s30 = sshll.u32 %s1241_s11, 7 }
 0x186   : > { %s426_s4 = ssub.s32 1664, %s1155_s30 }
 0x187   : > { %427 = vsyncadd %s413_s6, %s426_s4  ;;  %p528_p1 = scmp.ne.s32.totalorder %s1155_s30, 0  ;;  %s535_s24 = smul.u32 1664, %s944_s16 }
 0x188   : > { %s432_s5 = sshll.u32 %s1131_s29, 4  ;;  %s900_s10 = smov [#allocation7]   ;;  %s1168_s5 = int_to_ptr.vmem [resolvable:$true] %s432_s5 }
 0x189   : > { %s1166_s22 = scalar_lea.hbm %s1217_s3, %s535_s24  ;;  %s819_s9 = scalar_lea.vmem %s1168_s5, %s1155_s30 }
 0x18a   : > { %p820_p4 = scmp.ne.s32.totalorder %s1168_s5, %s819_s9  ;;  %s823_s19 = sshll.u32 %s900_s10, 4  ;;  %s824_s19 = int_to_ptr.vmem [resolvable:$false] %s823_s19 }
 0x18b   : > { %s825_s16 = scalar_lea.vmem %s824_s19, 3328  ;;  %p826_p12 = scmp.lt.s32.totalorder %s1168_s5, %s824_s19 }
 0x18c   : > { %p821_p5 = pnand %p820_p4, %p528_p1  ;;  %p827_p2 = scmp.lt.s32.totalorder %s825_s16, %s819_s9 }
 0x18e   : > { %p822_p11 = pneg %p821_p5  ;;  %p828_p3 = por %p827_p2, %p826_p12 }
 0x190   : > { %p829_p13 = pnand %p828_p3, %p822_p11 }
 0x192   : > { %832 = shalt.err (!%p829_p13)
}
 0x193   : > { %s833_s20 = scalar_lea.hbm %s1166_s22, %s1155_s30  ;;  %s837_s26 = scalar_lea.hbm %s1217_s3, 3200 }
 0x194   : > { %p834_p7 = scmp.ne.s32.totalorder %s1166_s22, %s833_s20  ;;  %p838_p9 = scmp.lt.u32.totalorder %s1166_s22, %s1217_s3 }
 0x195   : > { %p839_p10 = scmp.lt.u32.totalorder %s837_s26, %s833_s20  ;;  %p841_p5 = scmp.lt.u32.totalorder %s833_s20, %s1166_s22 }
 0x196   : > { %p835_p6 = pnand %p834_p7, %p528_p1 }
 0x197   : > { %p840_p4 = por %p839_p10, %p838_p9 }
 0x198   : > { %p836_p8 = pneg %p835_p6 }
 0x199   : > { %p842_p11 = por %p841_p5, %p840_p4 }
 0x19b   : > { %p843_p12 = pnand %p842_p11, %p836_p8 }
 0x19d   : > { %846 = shalt.err (!%p843_p12)
}
 0x19e   : > { %s901_s11 = smov 128   ;;  %s902_s4 = smov 8  }
 0x19f   : > { %438 = dma.vmem_to_hbm [thread:$0]  (%p528_p1), %s1168_s5, %s1155_s30, %s1166_s22, %s413_s6, %s901_s11, %s901_s11, %s902_s4  }
 0x1a0 PF: > { %s447_s24 = sand.u32 1, %s877_s12   ;;  %p1233_p2 = scmp.ne.s32.totalorder %s1224_s25, 0 }
 0x1a1   : > { %s448_s28 = scalar_lea.sflag [#allocation4], %s447_s24 }
 0x1a2   : > { %p689_p3 = pnand %p518_p0, %p1233_p2 }
 0x1a4   : > { %872 = dma.done.wait (!%p689_p3), %s448_s28, 1664  }
 0x1a5   : > { %874 = vsyncadd (!%p689_p3), %s448_s28, 4294965632  ;;  %p17_p13 = scmp.ge.s32.totalorder %s948_s18, 4   ;;  %s1234_s12 = smov %s881_s13 }
 0x1a6   : > { %s1235_s13 = smov %s885_s14  ;;  %s1236_s14 = smov %s960_s21 }
 0x1a7   : > { %s1237_s15 = smov %s948_s18  ;;  %19 = sbr.rel (!%p17_p13) target bundleno = 6 (0x6), region = 81 }
 0x1ae   :  { %453 = vsyncpa [#allocation3], 1 }
 0x1af   :  { %455 = vsyncpa [#allocation3 + $0x1], 1 }
 0x1b0   :  { %456 = vsyncpa [#allocation6], 1 }
 0x1b1   :  { %457 = vsyncpa [#allocation4], 1 }
 0x1b2   :  { %459 = vsyncpa [#allocation4 + $0x1], 1 }

</bundles_post_ra>
